<compile_context>
chip_gen: v7x
topology: tpu7x:2x2x1
jax: 0.10.0
libtpu: 0.0.40
codegen_flags: <defaults>
</compile_context>

<pallas_src>
import jax
import jax.numpy as jnp
from jax.experimental import pallas as pl
from jax.experimental.pallas import tpu as pltpu

_LANE = 128


def _add_pos_kernel(x_ref, pos_ref, o_ref):
    # Elementwise broadcast-add; the pos block has a leading 1 that broadcasts
    # over the batch rows of the x block.  Works for both the 2-D (lane-dense)
    # and 3-D (fallback) blockings.  The add promotes dtypes like jnp/PyTorch.
    o_ref[...] = (x_ref[...] + pos_ref[...]).astype(o_ref.dtype)


def _round_up(x, m):
    return ((x + m - 1) // m) * m


def _round_down(x, m):
    return max(m, (x // m) * m)


def _sublane_pack(itemsize):
    # Rows per native VMEM tile: 8 for 32-bit, 16 for 16-bit, 32 for 8-bit.
    return {4: 8, 2: 16, 1: 32}.get(itemsize, 8)


def _tile_target_and_budget():
    """Per-generation x-tile byte target and total VMEM buffer budget."""
    tile, budget = 4 << 20, 32 << 20  # safe defaults
    try:
        cap = int(pltpu.get_tpu_info().vmem_capacity_bytes)
        if cap <= (64 << 20):
            # v7x-class: 64 MiB VMEM/TC but ~3.2 TB/s HBM -> larger tiles to
            # amortize the ~0.35 us per-grid-step overhead.
            tile, budget = 8 << 20, 40 << 20
        else:
            # v5e/v6e-class: 128 MiB physical VMEM, slower HBM.
            tile, budget = 4 << 20, 44 << 20
    except Exception:
        pass  # hardware query unavailable -> conservative defaults
    return tile, budget


def _choose_tiles_2d(B, C, itemsize, tile_target, budget):
    """Tiles for the lane-dense (B, S*D) path; C is a multiple of 128."""
    sub = _sublane_pack(itemsize)
    # Row (batch) tile: whole batch when small, else a few sublane groups
    # (always a multiple of the sublane pack, or equal to the full dim).
    tb = B if B <= 4 * sub else 4 * sub
    tb_pad = _round_up(tb, sub)  # rows actually occupied in VMEM
    # Column tile: lane-dense multiple of 128, sized by (a) the per-tile byte
    # target and (b) the full double-buffered footprint
    #   bytes ~= itemsize * tc * (2*tb_pad [x] + 2*tb_pad [out] + 2*sub [pos])
    # where the (1, tc) pos block pads to `sub` sublanes per buffer.
    tc_target = tile_target // max(1, tb_pad * itemsize)
    tc_budget = budget // max(1, itemsize * (4 * tb_pad + 2 * sub))
    tc = min(tc_target, tc_budget)
    if tc >= C:
        tc = C
    else:
        tc = _round_down(tc, _LANE)
    # Megacore: a large single-block problem leaves v7x's second core idle;
    # split the column axis so there are at least 2 blocks.
    if (pl.cdiv(C, tc) * pl.cdiv(B, tb) < 2
            and C >= 2 * _LANE
            and B * C * itemsize >= (4 << 20)):
        tc = _round_up(pl.cdiv(C, 2), _LANE)
    footprint = itemsize * tc * (4 * tb_pad + 2 * sub)
    return tb, tc, footprint


def _choose_tiles_3d(B, S, D, itemsize, tile_target, budget):
    """Tiles for the (tb, ts, D) fallback path (S*D not a multiple of 128)."""
    sub = _sublane_pack(itemsize)
    d_pad = _round_up(D, _LANE)            # lane padding of the last dim
    row_bytes = d_pad * itemsize
    slab_bytes = _round_up(S, sub) * row_bytes  # one padded (S, D) slice
    # Batch rows per block (leading dim is not layout-padded): take more rows
    # when a full (S, D) slab is small, fewer when it is large.
    tb_target = max(1, tile_target // max(1, slab_bytes))
    tb_budget = max(1, (budget // max(1, slab_bytes) - 2) // 4)
    tb = max(1, min(B, tb_target, tb_budget))
    # Sequence tile: multiple of the sublane pack (or the full S).
    ts_target = tile_target // max(1, tb * row_bytes)
    #   bytes ~= row_bytes * ts_pad * (2*tb [x] + 2*tb [out] + 2 [pos])
    ts_budget = budget // max(1, row_bytes * (4 * tb + 2))
    ts = min(ts_target, ts_budget)
    if ts >= S:
        ts = S
        ts_pad = _round_up(S, sub)
    else:
        ts = _round_down(ts, sub)
        ts_pad = ts
    footprint = row_bytes * ts_pad * (4 * tb + 2)
    return tb, ts, footprint


def learned_positional_embedding_1d(x, pos_embedding, *, in_place=False):
    """x: (B, S, D); pos_embedding: (1, S, D). Returns x + pos_embedding.

    in_place=True aliases the output onto x's buffer; this only saves the
    output allocation (not bandwidth) and only if the caller donates x, which
    must then not be reused afterwards.
    """
    B, S, D = x.shape
    assert pos_embedding.shape == (1, S, D), pos_embedding.shape

    # PyTorch type-promotion semantics: result dtype = promote(x, pos).
    # The promotion happens inside the kernel, so no extra HBM cast pass.
    out_dtype = jnp.promote_types(x.dtype, pos_embedding.dtype)
    itemsize = jnp.dtype(out_dtype).itemsize

    C = S * D
    tile_target, budget = _tile_target_and_budget()

    alias = {0: 0} if (in_place and x.dtype == out_dtype) else {}

    cost = pl.CostEstimate(
        flops=B * C,
        transcendentals=0,
        bytes_accessed=(x.size * jnp.dtype(x.dtype).itemsize
                        + pos_embedding.size * jnp.dtype(pos_embedding.dtype).itemsize
                        + B * C * itemsize),
    )

    if C % _LANE == 0:
        # Lane-dense path: flatten (S, D) -> S*D so the output's last (lane)
        # dim is a large multiple of 128 (unmasked vst).  Row-major reshape is
        # a layout no-op.  Columns are the OUTER grid axis so the tiny shared
        # pos block is re-fetched only when the column block changes.
        tb, tc, footprint = _choose_tiles_2d(B, C, itemsize, tile_target, budget)
        grid = (pl.cdiv(C, tc), pl.cdiv(B, tb))
        in_specs = [
            pl.BlockSpec((tb, tc), lambda j, i: (i, j)),   # x tile
            pl.BlockSpec((1, tc), lambda j, i: (0, j)),    # shared pos tile
        ]
        out_specs = pl.BlockSpec((tb, tc), lambda j, i: (i, j))
        x_in = x.reshape(B, C)
        pos_in = pos_embedding.reshape(1, C)
        out_shape = jax.ShapeDtypeStruct((B, C), out_dtype)
    else:
        # Fallback (S*D not a multiple of 128): block the original 3-D shape
        # with the full D as the lane dim.  Stores may be lane-masked, but we
        # avoid an extra whole-array HBM pad-copy and keep VMEM bounded.
        tb, ts, footprint = _choose_tiles_3d(B, S, D, itemsize, tile_target, budget)
        grid = (pl.cdiv(S, ts), pl.cdiv(B, tb))
        in_specs = [
            pl.BlockSpec((tb, ts, D), lambda j, i: (i, j, 0)),
            pl.BlockSpec((1, ts, D), lambda j, i: (0, j, 0)),
        ]
        out_specs = pl.BlockSpec((tb, ts, D), lambda j, i: (i, j, 0))
        x_in = x
        pos_in = pos_embedding
        out_shape = jax.ShapeDtypeStruct((B, S, D), out_dtype)

    # Scoped-VMEM limit derived from the real double-buffered footprint
    # (including the sublane padding of the pos block), with headroom for
    # Mosaic's internal scratch; always below v7x's 64 MiB physical VMEM.
    vmem_limit = int(min(max(footprint + (4 << 20), 16 << 20), 52 << 20))

    out = pl.pallas_call(
        _add_pos_kernel,
        out_shape=out_shape,
        grid_spec=pltpu.PrefetchScalarGridSpec(
            num_scalar_prefetch=0,
            grid=grid,
            in_specs=in_specs,
            out_specs=out_specs,
        ),
        compiler_params=pltpu.CompilerParams(
            dimension_semantics=("parallel", "parallel"),
            vmem_limit_bytes=vmem_limit,
        ),
        cost_estimate=cost,
        input_output_aliases=alias,
    )(x_in, pos_in)

    return out.reshape(B, S, D)


if __name__ == "__main__":
    key = jax.random.PRNGKey(0)
    kx, kp, kx2, kp2, kx3 = jax.random.split(key, 5)

    # Shapes implied by the module's forward: (batch, seq_len, emb_dim).
    B, S, D = 2, 8, 32
    x = jax.random.normal(kx, (B, S, D), dtype=jnp.float32)
    # PyTorch inits the parameter to zeros; use a nonzero deterministic init
    # so the add is actually exercised.
    pos = jax.random.normal(kp, (1, S, D), dtype=jnp.float32) * 0.02

    out = jax.block_until_ready(learned_positional_embedding_1d(x, pos))
    ref = x + pos
    assert out.shape == (B, S, D) and out.dtype == ref.dtype
    assert jnp.allclose(out, ref, atol=1e-6), "mismatch (lane-dense path)"

    # Mixed-dtype case (bf16 activations + fp32 parameter): result must follow
    # type promotion (fp32), matching PyTorch semantics.
    x_m = x.astype(jnp.bfloat16)
    out_m = jax.block_until_ready(learned_positional_embedding_1d(x_m, pos))
    ref_m = x_m + pos
    assert out_m.dtype == jnp.float32
    assert jnp.allclose(out_m, ref_m, atol=1e-6), "mismatch (mixed-dtype path)"

    # Case where S*D is NOT a multiple of 128 (exercises the 3-D fallback).
    B2, S2, D2 = 3, 5, 24
    x_b = jax.random.normal(kx2, (B2, S2, D2), dtype=jnp.float32)
    pos_b = jax.random.normal(kp2, (1, S2, D2), dtype=jnp.float32) * 0.02
    out_b = jax.block_until_ready(learned_positional_embedding_1d(x_b, pos_b))
    ref_b = x_b + pos_b
    assert jnp.allclose(out_b, ref_b, atol=1e-6), "mismatch (fallback path)"

    print("KERNEL_OK")
</pallas_src>

<mosaic_0001>
module attributes {stable_mosaic.version = 11 : i64} {
  func.func @_add_pos_kernel(%arg0: i32, %arg1: i32, %arg2: memref<2x256xf32, #tpu.memory_space<vmem>>, %arg3: memref<1x256xf32, #tpu.memory_space<vmem>>, %arg4: memref<2x256xf32, #tpu.memory_space<vmem>>) attributes {dimension_semantics = [#tpu.dimension_semantics<parallel>, #tpu.dimension_semantics<parallel>], iteration_bounds = array<i64: 1, 1>, scalar_prefetch = 0 : i64, scratch_operands = 0 : i64, tpu.core_type = #tpu.core_type<tc>, window_params = [{transform_indices = @transform_0, window_bounds = array<i64: 2, 256>}, {transform_indices = @transform_1, window_bounds = array<i64: 1, 256>}, {transform_indices = @transform_2, window_bounds = array<i64: 2, 256>}]} {
    %c0 = arith.constant 0 : index
    %c0_0 = arith.constant 0 : index
    %0 = vector.load %arg2[%c0, %c0_0] : memref<2x256xf32, #tpu.memory_space<vmem>>, vector<2x256xf32>
    %c0_1 = arith.constant 0 : index
    %c0_2 = arith.constant 0 : index
    %1 = vector.load %arg3[%c0_1, %c0_2] : memref<1x256xf32, #tpu.memory_space<vmem>>, vector<1x256xf32>
    %2 = vector.broadcast %1 : vector<1x256xf32> to vector<2x256xf32>
    %3 = arith.addf %0, %2 : vector<2x256xf32>
    %c0_3 = arith.constant 0 : index
    %c0_4 = arith.constant 0 : index
    %4 = vector.load %arg4[%c0_3, %c0_4] : memref<2x256xf32, #tpu.memory_space<vmem>>, vector<2x256xf32>
    tpu.vector_store %arg4[%c0_3, %c0_4], %3 {strides = array<i32>} : memref<2x256xf32, #tpu.memory_space<vmem>>, vector<2x256xf32>,
    return
  }
  func.func @transform_0(%arg0: i32, %arg1: i32) -> (i32, i32) {
    %c0_i32 = arith.constant 0 : i32
    return %arg1, %arg0 : i32, i32
  }
  func.func @transform_1(%arg0: i32, %arg1: i32) -> (i32, i32) {
    %c0_i32 = arith.constant 0 : i32
    %c0_i32_0 = arith.constant 0 : i32
    return %c0_i32, %arg0 : i32, i32
  }
  func.func @transform_2(%arg0: i32, %arg1: i32) -> (i32, i32) {
    %c0_i32 = arith.constant 0 : i32
    return %arg1, %arg0 : i32, i32
  }
}

</mosaic_0001>

<bundles_post_ra>
// kernel: tpu_custom_call.1
= control target key start
LH: loop header
LB: loop body
LE: loop exit
PB: predicated region body
PF: predicated region fallthrough
CT: control target
= control target key end

     0   :  { %7 = vsyncpa [#allocation3], 0  ;;  %s157_s0 = inlined_call_operand.hbm [shape: f32[2,256], index: 0, kind: input, shape index: {}]   ;;  %s158_s1 = inlined_call_operand.vmem [shape: f32[1,256], index: 1, kind: input, shape index: {}]   ;;  %s159_s2 = inlined_call_operand.hbm [shape: f32[2,256], index: 2, kind: output, shape index: {}]  }
   0x1   :  { %8 = vsyncpa [#allocation4], 0  ;;  %s112_s9 = smov [#allocation2]   ;;  %s64_s13 = scalar_lea.hbm %s157_s0, 64 }
   0x2   :  { %s15_s10 = sshll.u32 %s112_s9, 4  ;;  %p65_p0 = scmp.ne.s32.totalorder %s157_s0, %s64_s13  ;;  %s16_s10 = int_to_ptr.vmem [resolvable:$true] %s15_s10 }
   0x3   :  { %p68_p1 = scmp.lt.u32.totalorder %s64_s13, %s157_s0 }
   0x5   :  { %p70_p2 = pnand %p68_p1, %p65_p0 }
   0x7   :  { %73 = shalt.err (!%p70_p2)
}
   0x8   :  { %s74_s18 = scalar_lea.vmem %s16_s10, 64  ;;  %p79_p4 = scmp.lt.s32.totalorder %s16_s10, %s16_s10 }
   0x9   :  { %p75_p3 = scmp.ne.s32.totalorder %s16_s10, %s74_s18  ;;  %p80_p5 = scmp.lt.s32.totalorder %s74_s18, %s74_s18 }
   0xb   :  { %p81_p6 = por %p80_p5, %p79_p4 }
   0xd   :  { %p82_p7 = pnand %p81_p6, %p75_p3 }
   0xf   :  { %85 = shalt.err (!%p82_p7)
}
  0x10   :  { %18 = dma.hbm_to_vmem [thread:$0]  %s157_s0, 64, %s16_s10, [#allocation3]  }
  0x11   :  { %108 = dma.done.wait [#allocation3], 64  }
  0x12   :  { %109 = vsyncadd [#allocation3], 4294967232  ;;  %v27_v0 = vlaneseq  ;;  %v113_v1 = vmov 1983009808   ;;  %v25_v7 = vld [vmem:[%s158_s1] sm:$0x3] }
  0x13   :  { %v37_v2 = vunpack.c.l.s4 %v113_v1  ;;  %v24_v12 = vld [vmem:[#allocation2] sm:$0xf]  ;;  %s114_s23 = smov [#allocation5]  }
  0x14   :  { %v28_v3 = vshrl.u32 %v27_v0, 7  ;;  %s52_s0 = sshll.u32 %s114_s23, 4  ;;  %s53_s0 = int_to_ptr.vmem [resolvable:$true] %s52_s0 }
  0x15   :  { %v38_v6 = vunpack.c.0.s8 %v37_v2  ;;  %s86_s24 = scalar_lea.vmem %s53_s0, 64  ;;  %p91_p9 = scmp.lt.s32.totalorder %s53_s0, %s53_s0 }
  0x16   :  { %v29_v4 = vsub.s32 0, %v28_v3  ;;  %v33_v5 = vsub.s32 1, %v28_v3  ;;  %p87_p8 = scmp.ne.s32.totalorder %s53_s0, %s86_s24  ;;  %p92_p10 = scmp.lt.s32.totalorder %s86_s24, %s86_s24 }
  0x17   :  { %v41_v10 = vsub.s32 %v38_v6, %v28_v3 }
  0x18   :  { %v30_v8 = vrot.slane %v25_v7, %v29_v4  ;;  %v34_v9 = vrot.slane %v25_v7, %v33_v5  ;;  %p93_p11 = por %p92_p10, %p91_p9 }
  0x1a   :  { %v35_v11 = vcombine.low %v30_v8, %v34_v9  ;;  %p94_p12 = pnand %p93_p11, %p87_p8 }
  0x1c   :  { %v42_v13 = vrot.slane %v35_v11, %v41_v10 }
  0x1e   :  { %v44_v14 = vadd.f32 %v42_v13, %v24_v12 }
  0x20   :  { %45 = vst [vmem:[#allocation5] sm:$0xf] %v44_v14 }
  0x21   :  { %97 = shalt.err (!%p94_p12)
}
  0x22   :  { %s98_s26 = scalar_lea.hbm %s159_s2, 64 }
  0x23   :  { %p99_p13 = scmp.ne.s32.totalorder %s159_s2, %s98_s26  ;;  %p102_p0 = scmp.lt.u32.totalorder %s98_s26, %s159_s2 }
  0x25   :  { %p104_p1 = pnand %p102_p0, %p99_p13 }
  0x27   :  { %107 = shalt.err (!%p104_p1)
}
  0x28   :  { %55 = dma.vmem_to_hbm [thread:$0]  %s53_s0, 64, %s159_s2, [#allocation4]  }
  0x29   :  { %110 = dma.done.wait [#allocation4], 64  }
  0x2a   :  { %111 = vsyncadd [#allocation4], 4294967232 }
  0x2b   :  { %59 = vsyncpa [#allocation3], 1 }
  0x2c   :  { %60 = vsyncpa [#allocation4], 1 }

</bundles_post_ra>
